<compile_context>
chip_gen: v7x
topology: tpu7x:2x2x1
jax: 0.10.0
libtpu: 0.0.40
codegen_flags: <defaults>
</compile_context>

<pallas_src>
import functools
import math

import jax
import jax.numpy as jnp
from jax.experimental import pallas as pl
from jax.experimental.pallas import tpu as pltpu


_ROW_ALIGN = 16            # sublane-tile friendly for both f32 (8,128) and bf16 (16,128)
_VMEM_BUDGET = 24 << 20    # keep double-buffered x + out tiles under this


def _round_up(x: int, m: int) -> int:
    return ((x + m - 1) // m) * m


def _max_out_lanes() -> int:
    """Generation-aware packed-output width: 256 on v6e/v7x (256-wide MXU),
    128 on v5e and older (128-wide MXU, single vst slot)."""
    try:
        kind = jax.devices()[0].device_kind.lower()
    except Exception:
        return 128
    if ("v6" in kind) or ("v7" in kind):
        return 256
    return 128


def _choose_pack(f_in: int, f_out: int, max_out_lanes: int, itemsize: int,
                 max_weight_bytes: int = 2 << 20) -> int:
    """Pick P so P*f_out is a multiple of 128 (unmasked full-lane stores) and,
    when the budget / lane cap allows, P*f_in >= 128 too (full-lane x loads)."""
    if f_out >= max_out_lanes:
        return 1
    base = 128 // math.gcd(f_out, 128)       # smallest P with (P*f_out) % 128 == 0
    if base * f_out > max_out_lanes:
        return 1
    p = base
    while (p * f_in < 128
           and (p + base) * f_out <= max_out_lanes
           and ((p + base) * f_in) * ((p + base) * f_out) * itemsize
               <= max_weight_bytes):
        p += base
    return p


def _sage_mlp_kernel(x_ref, w_ref, b_ref, *rest, normalize: bool):
    # x_ref: (TM, P*F_in)        packed node-feature tile (streamed)
    # w_ref: (P*F_in, P*F_out)   block-diagonal fused weight (resident, tiny)
    # b_ref: (1, P*F_out)        P-tiled bias, f32 (resident)
    # g_ref: (P*F_out, P*F_out)  block-diag ones group-sum matrix (normalize only)
    # o_ref: (TM, P*F_out)       lane-dense output tile (streamed)
    if normalize:
        g_ref, o_ref = rest
    else:
        (o_ref,) = rest

    out = jnp.dot(x_ref[...], w_ref[...], preferred_element_type=jnp.float32)
    out = out + b_ref[...]                       # bias add stays f32
    if normalize:
        # Per-node sum of squares within each pack group via a tiny MXU matmul
        # (every lane of a group carries its group sum), then rsqrt (EUP slot).
        # F.normalize(p=2,dim=-1): x / max(||x||, 1e-12) == x*rsqrt(max(||x||^2,1e-24))
        ss = jnp.dot(out * out, g_ref[...], preferred_element_type=jnp.float32)
        out = out * jax.lax.rsqrt(jnp.maximum(ss, 1e-24))
    o_ref[...] = out.astype(o_ref.dtype)


def make_sage_conv_peer_mlp(w_l, b_l, w_r, *, normalize=False, tm=4096,
                            stream_dtype=None):
    """Build the packed parameters ONCE and return a jitted apply(x).

    w_l / w_r: [F_in, F_out] (transposed vs torch's [out, in]); b_l: [F_out].
    stream_dtype=jnp.bfloat16 halves x/out HBM traffic (compute stays f32).
    """
    f_in, f_out = int(w_l.shape[0]), int(w_l.shape[1])
    weight_dtype = stream_dtype or jnp.float32
    itemsize = jnp.dtype(weight_dtype).itemsize

    pack = _choose_pack(f_in, f_out, _max_out_lanes(), itemsize)
    fi, fo = pack * f_in, pack * f_out

    # ---- hoisted weight prep (runs once, NOT per forward) ----
    w_fused = (w_l + w_r).astype(jnp.float32)
    if pack > 1:
        w_pack = jnp.kron(jnp.eye(pack, dtype=jnp.float32), w_fused)
        b_pack = jnp.tile(b_l.reshape(1, f_out).astype(jnp.float32), (1, pack))
    else:
        w_pack = w_fused
        b_pack = b_l.reshape(1, f_out).astype(jnp.float32)
    w_pack = w_pack.astype(weight_dtype)
    grp = jnp.arange(fo) // f_out
    g_mat = (grp[:, None] == grp[None, :]).astype(jnp.float32)   # block-diag ones

    kernel = functools.partial(_sage_mlp_kernel, normalize=normalize)

    @jax.jit
    def apply(x):
        n, fx = x.shape
        assert fx == f_in, "feature dim mismatch"
        xs = x if stream_dtype is None else x.astype(stream_dtype)
        o_dtype = x.dtype if stream_dtype is None else stream_dtype

        # Pad only to a multiple of `pack` (<= pack-1 rows) for the packing
        # reshape; the row-tile grid itself is ragged (no full-tile zero pad).
        n_al = _round_up(n, pack)
        if n_al != n:
            xs = jnp.pad(xs, ((0, n_al - n), (0, 0)))
        rows = n_al // pack
        xp = xs.reshape(rows, fi)

        # Row tile: large (amortizes per-step overhead), clamped to the VMEM
        # budget and to >= 2 grid steps so both v7x TensorCores get work.
        itemsz = jnp.dtype(xp.dtype).itemsize
        bytes_per_row = (fi + fo) * itemsz
        max_tm = max(_ROW_ALIGN,
                     (_VMEM_BUDGET // (2 * bytes_per_row))
                     // _ROW_ALIGN * _ROW_ALIGN)
        tm_eff = min(_round_up(tm, _ROW_ALIGN), _round_up(rows, _ROW_ALIGN), max_tm)
        if rows > _ROW_ALIGN:
            tm_eff = min(tm_eff, _round_up(-(-rows // 2), _ROW_ALIGN))
        tm_eff = max(tm_eff, _ROW_ALIGN)
        grid = pl.cdiv(rows, tm_eff)

        flops = 2 * rows * fi * fo + (2 * rows * fo * fo if normalize else 0)
        cost = pl.CostEstimate(
            flops=flops,
            transcendentals=rows * fo if normalize else 0,
            bytes_accessed=(xp.size + rows * fo) * itemsz
                           + w_pack.size * w_pack.dtype.itemsize
                           + b_pack.size * 4
                           + (g_mat.size * 4 if normalize else 0),
        )

        in_specs = [
            pl.BlockSpec((tm_eff, fi), lambda i: (i, 0)),   # x row tile (streamed)
            pl.BlockSpec((fi, fo), lambda i: (0, 0)),       # fused weight (resident)
            pl.BlockSpec((1, fo), lambda i: (0, 0)),        # bias (resident)
        ]
        operands = [xp, w_pack, b_pack]
        if normalize:
            in_specs.append(pl.BlockSpec((fo, fo), lambda i: (0, 0)))  # group matrix
            operands.append(g_mat)

        out = pl.pallas_call(
            kernel,
            out_shape=jax.ShapeDtypeStruct((rows, fo), o_dtype),
            grid_spec=pltpu.PrefetchScalarGridSpec(
                num_scalar_prefetch=0,
                grid=(grid,),
                in_specs=in_specs,
                out_specs=pl.BlockSpec((tm_eff, fo), lambda i: (i, 0)),
            ),
            compiler_params=pltpu.CompilerParams(
                dimension_semantics=("parallel",)),
            cost_estimate=cost,
        )(*operands)

        # Un-pack lanes back to one node per row; drop pack-padding rows.
        return out.reshape(n_al, f_out)[:n]

    return apply


def sage_conv_peer_mlp(x, w_l, b_l, w_r, *, normalize=False, tm=4096,
                       stream_dtype=None):
    """One-shot convenience wrapper (prefer make_sage_conv_peer_mlp to cache the
    packed weights across calls / training steps)."""
    return make_sage_conv_peer_mlp(
        w_l, b_l, w_r, normalize=normalize, tm=tm, stream_dtype=stream_dtype)(x)


def _init_linear_params(key, in_features, out_features, bias=True):
    """Deterministic init mimicking torch.nn.Linear.reset_parameters ranges."""
    kw, kb = jax.random.split(key)
    bound = 1.0 / jnp.sqrt(in_features)
    # Stored as [in, out] (transpose of torch's [out, in]) for row-major matmul.
    w = jax.random.uniform(kw, (in_features, out_features), jnp.float32,
                           minval=-bound, maxval=bound)
    b = (jax.random.uniform(kb, (out_features,), jnp.float32,
                            minval=-bound, maxval=bound)
         if bias else jnp.zeros((out_features,), jnp.float32))
    return w, b


if __name__ == "__main__":
    key = jax.random.PRNGKey(0)
    k_x, k_l, k_r, k_x2 = jax.random.split(key, 4)

    N, F_in, F_out = 256, 32, 64          # small synthetic node-feature matrix
    x = jax.random.normal(k_x, (N, F_in), jnp.float32)
    w_l, b_l = _init_linear_params(k_l, F_in, F_out, bias=True)
    w_r, _ = _init_linear_params(k_r, F_in, F_out, bias=False)   # lin_r: no bias

    ref = x @ w_l + b_l[None, :] + x @ w_r

    # 1) f32, normalize=False
    fwd = make_sage_conv_peer_mlp(w_l, b_l, w_r, normalize=False)
    out = jax.block_until_ready(fwd(x))
    assert out.shape == (N, F_out)
    assert jnp.allclose(out, ref, atol=1e-5, rtol=1e-5)

    # 2) f32, normalize=True (lane-dense packing stays on; group-sum on MXU)
    fwd_n = make_sage_conv_peer_mlp(w_l, b_l, w_r, normalize=True)
    out_n = jax.block_until_ready(fwd_n(x))
    ref_n = ref / jnp.maximum(jnp.linalg.norm(ref, axis=-1, keepdims=True), 1e-12)
    assert out_n.shape == (N, F_out)
    assert jnp.allclose(out_n, ref_n, atol=2e-3, rtol=2e-3)

    # 3) ragged N (exercises the cdiv grid + pack padding) with bf16 streaming
    N2 = 1003
    x2 = jax.random.normal(k_x2, (N2, F_in), jnp.float32)
    fwd_bf16 = make_sage_conv_peer_mlp(w_l, b_l, w_r, normalize=False,
                                       stream_dtype=jnp.bfloat16)
    out2 = jax.block_until_ready(fwd_bf16(x2))
    ref2 = x2 @ w_l + b_l[None, :] + x2 @ w_r
    assert out2.shape == (N2, F_out)
    assert out2.dtype == jnp.bfloat16
    assert jnp.allclose(out2.astype(jnp.float32), ref2, atol=8e-2, rtol=8e-2)

    print("KERNEL_OK")
</pallas_src>

<mosaic_0001>
module attributes {stable_mosaic.version = 11 : i64} {
  func.func @_sage_mlp_kernel(%arg0: i32, %arg1: memref<64x64xf32, #tpu.memory_space<vmem>>, %arg2: memref<64x128xf32, #tpu.memory_space<vmem>>, %arg3: memref<1x128xf32, #tpu.memory_space<vmem>>, %arg4: memref<64x128xf32, #tpu.memory_space<vmem>>) attributes {dimension_semantics = [#tpu.dimension_semantics<parallel>], iteration_bounds = array<i64: 2>, scalar_prefetch = 0 : i64, scratch_operands = 0 : i64, tpu.core_type = #tpu.core_type<tc>, window_params = [{transform_indices = @transform_0, window_bounds = array<i64: 64, 64>}, {pipeline_mode = #tpu.pipeline_mode<synchronous>, transform_indices = @transform_1, window_bounds = array<i64: 64, 128>}, {pipeline_mode = #tpu.pipeline_mode<synchronous>, transform_indices = @transform_2, window_bounds = array<i64: 1, 128>}, {transform_indices = @transform_3, window_bounds = array<i64: 64, 128>}]} {
    %c0 = arith.constant 0 : index
    %c0_0 = arith.constant 0 : index
    %0 = vector.load %arg1[%c0, %c0_0] : memref<64x64xf32, #tpu.memory_space<vmem>>, vector<64x64xf32>
    %c0_1 = arith.constant 0 : index
    %c0_2 = arith.constant 0 : index
    %1 = vector.load %arg2[%c0_1, %c0_2] : memref<64x128xf32, #tpu.memory_space<vmem>>, vector<64x128xf32>
    %cst = arith.constant dense<0.000000e+00> : vector<64x128xf32>
    %2 = tpu.matmul %0, %1, %cst {dimension_numbers = #tpu.dot_dimension_numbers<[1], [0], [0], [1], [0, 0, 1, 1], [], []>} : vector<64x64xf32>, vector<64x128xf32>, vector<64x128xf32> -> vector<64x128xf32>
    %c0_3 = arith.constant 0 : index
    %c0_4 = arith.constant 0 : index
    %3 = vector.load %arg3[%c0_3, %c0_4] : memref<1x128xf32, #tpu.memory_space<vmem>>, vector<1x128xf32>
    %4 = vector.broadcast %3 : vector<1x128xf32> to vector<64x128xf32>
    %5 = arith.addf %2, %4 : vector<64x128xf32>
    %c0_5 = arith.constant 0 : index
    %c0_6 = arith.constant 0 : index
    %6 = vector.load %arg4[%c0_5, %c0_6] : memref<64x128xf32, #tpu.memory_space<vmem>>, vector<64x128xf32>
    tpu.vector_store %arg4[%c0_5, %c0_6], %5 {strides = array<i32>} : memref<64x128xf32, #tpu.memory_space<vmem>>, vector<64x128xf32>,
    return
  }
  func.func @transform_0(%arg0: i32) -> (i32, i32) {
    %c0_i32 = arith.constant 0 : i32
    %c0_i32_0 = arith.constant 0 : i32
    return %arg0, %c0_i32 : i32, i32
  }
  func.func @transform_1(%arg0: i32) -> (i32, i32) {
    %c0_i32 = arith.constant 0 : i32
    %c0_i32_0 = arith.constant 0 : i32
    %c0_i32_1 = arith.constant 0 : i32
    return %c0_i32, %c0_i32_0 : i32, i32
  }
  func.func @transform_2(%arg0: i32) -> (i32, i32) {
    %c0_i32 = arith.constant 0 : i32
    %c0_i32_0 = arith.constant 0 : i32
    %c0_i32_1 = arith.constant 0 : i32
    return %c0_i32, %c0_i32_0 : i32, i32
  }
  func.func @transform_3(%arg0: i32) -> (i32, i32) {
    %c0_i32 = arith.constant 0 : i32
    %c0_i32_0 = arith.constant 0 : i32
    return %arg0, %c0_i32 : i32, i32
  }
}

</mosaic_0001>

<bundles_post_ra>
// kernel: apply.1
= control target key start
LH: loop header
LB: loop body
LE: loop exit
PB: predicated region body
PF: predicated region fallthrough
CT: control target
= control target key end

     0   :  { %s515_s12 = smov 0   ;;  %s574_s0 = inlined_call_operand.vmem [shape: f32[128,64], index: 0, kind: input, shape index: {}]   ;;  %s575_s1 = inlined_call_operand.vmem [shape: f32[64,128], index: 1, kind: input, shape index: {}]   ;;  %s576_s2 = inlined_call_operand.vmem [shape: f32[1,128], index: 2, kind: input, shape index: {}]   ;;  %s577_s3 = inlined_call_operand.vmem [shape: f32[128,128], index: 3, kind: output, shape index: {}]  }
   0x1 LB: > { %s391_s13 = sadd.s32 4294967295, %s493_s12   ;;  %p395_p0 = scmp.ge.s32.totalorder %s493_s12, 1  ;;  %s493_s12 = sphi %s515_s12, %s13_s12  }
   0x2   : > { %p138_p1 = scmp.lt.s32.totalorder %s493_s12, 3 }
   0x4   : > { %p139_p2 = pnand %p395_p0, %p138_p1 }
   0x5   : > { %v182_v0 = vld [vmem:[%s575_s1] sm:$0xff] (!%p139_p2)  ;;  %v183_v1 = vld [vmem:[%s575_s1 + $0x8] sm:$0xff] (!%p139_p2)  ;;  %v184_v2 = vld [vmem:[%s575_s1 + $0x10] sm:$0xff] (!%p139_p2)  ;;  %s396_s20 = sshll.u32 (!%p139_p2), %s391_s13, 3  ;;  %vm197_vm0 = vcmask (!%p139_p2), 523264  }
   0x6   : > { %142 = sbr.rel (%p139_p2) target bundleno = 245 (0xf5), region = 32  ;;  %v455_v3 = vpack.c.bf16 (!%p139_p2), %v183_v1, %v182_v0  ;;  %v185_v4 = vld [vmem:[%s575_s1 + $0x18] sm:$0xff] (!%p139_p2)  ;;  %p163_p3 = scmp.lt.s32.totalorder (!%p139_p2), %s396_s20, 15  ;;  %v186_v6 = vld [vmem:[%s575_s1 + $0x20] sm:$0xff] (!%p139_p2)  ;;  %v187_v7 = vld [vmem:[%s575_s1 + $0x28] sm:$0xff] (!%p139_p2) }
   0x7   : > { %v459_v5 = vpack.c.bf16 (!%p139_p2), %v185_v4, %v184_v2  ;;  %v463_v8 = vpack.c.bf16 (!%p139_p2), %v187_v7, %v186_v6  ;;  %v188_v9 = vld [vmem:[%s575_s1 + $0x30] sm:$0xff] (!%p139_p2)  ;;  %v189_v10 = vld [vmem:[%s575_s1 + $0x38] sm:$0xff] (!%p139_p2)  ;;  %v400_v20 = vld [vmem:[%s576_s2] ss:$0 sm:$0xff] (!%p139_p2) }
   0x8   : > { %456 = vmatprep.subr.bf16.mxu0 (!%p139_p2), %v455_v3  ;;  %471 = vmatprep.subr.bf16.mxu1 (!%p139_p2), %v455_v3  ;;  %v467_v13 = vpack.c.bf16 (!%p139_p2), %v189_v10, %v188_v9 }
   0x9   : > { %458 = vmatpush3.bf16.msra.mxu0 (!%p139_p2), %v455_v3  ;;  %475 = vmatpush3.bf16.msra.mxu1 (!%p139_p2), %v455_v3 }
   0xa   : > { %460 = vmatprep.subr.bf16.mxu0 (!%p139_p2), %v459_v5  ;;  %472 = vmatprep.subr.bf16.mxu1 (!%p139_p2), %v459_v5 }
   0xd   : > { %s579_s20 = smov (!%p163_p3, %s396_s20), 15  ;;  %462 = vmatpush3.bf16.msra.mxu0 %v459_v5  ;;  %476 = vmatpush3.bf16.msra.mxu1 %v459_v5 }
   0xe   : > { %s397_s27 = sshll.u32 %s579_s20, 3  ;;  %464 = vmatprep.subr.bf16.mxu0 %v463_v8  ;;  %473 = vmatprep.subr.bf16.mxu1 %v463_v8 }
   0xf   : > { %s166_s7 = scalar_lea.vmem %s574_s0, %s397_s27  ;;  %s172_s13 = scalar_lea.vmem %s577_s3, %s397_s27 }
  0x10   : > { %v174_v11 = vld [vmem:[%s166_s7] sm:$0xff]  ;;  %v175_v14 = vld [vmem:[%s166_s7 + $0x8] sm:$0xff]  ;;  %v176_v16 = vld [vmem:[%s166_s7 + $0x10] sm:$0xff] }
  0x11   : > { %v178_v12 = vld [vmem:[%s166_s7 + $0x20] sm:$0xff]  ;;  %443 = vmatprep.mubr.msk.f32.mxu0 %vm197_vm0, %v174_v11  ;;  %466 = vmatpush3.bf16.msra.mxu0 %v463_v8  ;;  %v179_v15 = vld [vmem:[%s166_s7 + $0x28] sm:$0xff]  ;;  %v180_v17 = vld [vmem:[%s166_s7 + $0x30] sm:$0xff] }
  0x12   : > { %449 = vmatprep.mubr.msk.f32.mxu1 %vm197_vm0, %v178_v12  ;;  %477 = vmatpush3.bf16.msra.mxu1 %v463_v8  ;;  %v177_v18 = vld [vmem:[%s166_s7 + $0x18] sm:$0xff] }
  0x13   : > { %468 = vmatprep.subr.bf16.mxu0 %v467_v13  ;;  %474 = vmatprep.subr.bf16.mxu1 %v467_v13  ;;  %v181_v19 = vld [vmem:[%s166_s7 + $0x38] sm:$0xff] }
  0x15   : > { %470 = vmatpush3.bf16.msra.mxu0 %v467_v13 }
  0x16   : > { %478 = vmatpush3.bf16.msra.mxu1 %v467_v13 }
  0x18   : > { %444 = vmatmul.mubr.msk.f32.vlgmr.msra.gmra.mrb[0].mxu0 %vm197_vm0, %v175_v14 }
  0x19   : > { %450 = vmatmul.mubr.msk.f32.vlgmr.msra.gmra.mrb[0].mxu1 %vm197_vm0, %v179_v15  ;;  %446 = vmatprep.mubr.msk.f32.mxu0 %vm197_vm0, %v176_v16 }
  0x1a   : > { %452 = vmatprep.mubr.msk.f32.mxu1 %vm197_vm0, %v180_v17 }
  0x1c   : > { %447 = vmatmul.mubr.msk.f32.gmra.mrb[2].mxu0 %vm197_vm0, %v177_v18 }
  0x1d   : > { %453 = vmatmul.mubr.msk.f32.gmra.mrb[2].mxu1 %vm197_vm0, %v181_v19 }
  0xeb   : > { %v445_v21 = vpop.f32.mrb[0].mxu0 }
  0xec   : > { %v451_v22 = vpop.f32.mrb[0].mxu1  ;;  %v294_v23 = vadd.f32 %v445_v21, %v400_v20  ;;  %v288_v25 = vpop.f32.mrb[1].mxu0 }
  0xed   : > { %v314_v24 = vadd.f32 %v451_v22, %v400_v20  ;;  %v308_v26 = vpop.f32.mrb[1].mxu1  ;;  %v289_v27 = vadd.f32 %v400_v20, %v288_v25 }
  0xee   : > { %v309_v28 = vadd.f32 %v400_v20, %v308_v26  ;;  %328 = vst [vmem:[%s172_s13 + $0x8] sm:$0xff] %v294_v23 }
  0xef   : > { %332 = vst [vmem:[%s172_s13 + $0x28] sm:$0xff] %v314_v24  ;;  %327 = vst [vmem:[%s172_s13] sm:$0xff] %v289_v27  ;;  %v448_v29 = vpop.f32.mrb[2].mxu0 }
  0xf0   : > { %331 = vst [vmem:[%s172_s13 + $0x20] sm:$0xff] %v309_v28  ;;  %v454_v30 = vpop.f32.mrb[2].mxu1  ;;  %v304_v31 = vadd.f32 %v448_v29, %v400_v20  ;;  %v298_v33 = vpop.f32.mrb[3].mxu0 }
  0xf1   : > { %v324_v32 = vadd.f32 %v454_v30, %v400_v20  ;;  %v318_v34 = vpop.f32.mrb[3].mxu1  ;;  %v299_v35 = vadd.f32 %v400_v20, %v298_v33 }
  0xf2   : > { %v319_v36 = vadd.f32 %v400_v20, %v318_v34  ;;  %330 = vst [vmem:[%s172_s13 + $0x18] sm:$0xff] %v304_v31 }
  0xf3   : > { %334 = vst [vmem:[%s172_s13 + $0x38] sm:$0xff] %v324_v32  ;;  %329 = vst [vmem:[%s172_s13 + $0x10] sm:$0xff] %v299_v35 }
  0xf4   : > { %333 = vst [vmem:[%s172_s13 + $0x30] sm:$0xff] %v319_v36 }
  0xf5 PF: > { %s13_s12 = sadd.s32 1, %s493_s12  }
  0xf6   : > { %p10_p4 = scmp.ge.s32.totalorder %s13_s12, 4  }
  0xf8   :  { %12 = sbr.rel (!%p10_p4) target bundleno = 1 (0x1), region = 62 }

</bundles_post_ra>
